<compile_context>
chip_gen: v6e
topology: v6e:2x2x1
jax: 0.10.0
libtpu: 0.0.40
codegen_flags: <defaults>
</compile_context>

<pallas_src>
import jax
import jax.numpy as jnp
from jax.experimental import pallas as pl
from jax.experimental.pallas import tpu as pltpu

_LANE = 128


def _round_up(n, m):
    return ((n + m - 1) // m) * m


def prepare_params(w1, b1, w2, b2):
    """Pad the hidden (50) dim to 128 lanes once, at weight-creation time.

    w1: (in, 50), b1: (1, 50), w2: (50, out), b2: (1, out).
    Output dim of w2/b2 stays unpadded (HBM writeback stays narrow).
    Padded hidden columns/rows are exact zeros, so results are unchanged.
    """
    f32 = jnp.float32
    in_size, hidden = w1.shape
    out_size = w2.shape[1]
    hidden_p = _round_up(hidden, _LANE)
    w1p = jnp.zeros((in_size, hidden_p), f32).at[:, :hidden].set(w1.astype(f32))
    b1p = jnp.zeros((1, hidden_p), f32).at[:, :hidden].set(b1.astype(f32))
    w2p = jnp.zeros((hidden_p, out_size), f32).at[:hidden, :].set(w2.astype(f32))
    b2p = b2.astype(f32).reshape(1, out_size)
    return w1p, b1p, w2p, b2p


def _mlp_kernel(x_ref, w1_ref, b1_ref, w2_ref, b2_ref, o_ref):
    # hidden = leaky_relu(x @ W1 + b1); padded hidden columns stay exactly 0
    # (bias pad is 0 and LeakyReLU(0) == 0), and padded W2 rows are 0, so the
    # padding never leaks into the output.
    h = jnp.dot(x_ref[...], w1_ref[...],
                preferred_element_type=jnp.float32,
                precision=jax.lax.Precision.HIGHEST)
    h = h + b1_ref[...]                    # (TB, Hp) + (1, Hp) broadcast
    h = jnp.maximum(h, 0.01 * h)           # LeakyReLU, default slope 0.01
    o = jnp.dot(h, w2_ref[...],
                preferred_element_type=jnp.float32,
                precision=jax.lax.Precision.HIGHEST)
    o_ref[...] = (o + b2_ref[...]).astype(o_ref.dtype)


def cnn_forward(x, w1p, b1p, w2p, b2p, *, block_b=8192):
    """x: (B, input_size); padded params from prepare_params().

    Returns (B, out_size) f32, identical to layer3 of the PyTorch module.
    """
    B, in_size = x.shape
    hidden_p = w1p.shape[1]
    out_size = w2p.shape[1]
    f32 = jnp.float32
    x = x.astype(f32)

    if B <= 1024:
        # Single block, no grid: whole operands resident in VMEM (a few KiB);
        # launch + one DMA per operand is the entire cost.
        return pl.pallas_call(
            _mlp_kernel,
            out_shape=jax.ShapeDtypeStruct((B, out_size), f32),
            in_specs=[pl.BlockSpec(memory_space=pltpu.MemorySpace.VMEM)] * 5,
            out_specs=pl.BlockSpec(memory_space=pltpu.MemorySpace.VMEM),
        )(x, w1p, b1p, w2p, b2p)

    # ---- streaming path: tile over batch, weights stay VMEM-resident ------
    # Cap the tile at ceil(B/2) (rounded to the 8-sublane granule) so the
    # "parallel" grid has >= 2 steps and both TensorCores are used on v7x.
    tb = min(block_b, _round_up(-(-B // 2), 8))
    tb = _round_up(tb, 8)
    grid = (pl.cdiv(B, tb),)

    out = pl.pallas_call(
        _mlp_kernel,
        out_shape=jax.ShapeDtypeStruct((B, out_size), f32),
        grid=grid,
        in_specs=[
            pl.BlockSpec((tb, in_size), lambda i: (i, 0)),         # x: streamed
            pl.BlockSpec((in_size, hidden_p), lambda i: (0, 0)),   # W1: resident
            pl.BlockSpec((1, hidden_p), lambda i: (0, 0)),         # b1: resident
            pl.BlockSpec((hidden_p, out_size), lambda i: (0, 0)),  # W2: resident
            pl.BlockSpec((1, out_size), lambda i: (0, 0)),         # b2: resident
        ],
        out_specs=pl.BlockSpec((tb, out_size), lambda i: (i, 0)),
        compiler_params=pltpu.CompilerParams(
            # batch tiles are independent -> shard across both TCs on v7x
            dimension_semantics=("parallel",),
        ),
    )(x, w1p, b1p, w2p, b2p)
    return out


if __name__ == "__main__":
    input_size = 32      # Linear(in_features=input_size, out_features=50)
    hidden = 50
    output_size = 8

    key = jax.random.PRNGKey(0)
    kx, k1, k2, k3, k4, kx2, kx3 = jax.random.split(key, 7)

    # Kernel keeps weights in transposed (in, out) layout; biases as (1, out).
    w1 = jax.random.normal(k1, (input_size, hidden), dtype=jnp.float32) * 0.1
    b1 = jax.random.normal(k2, (1, hidden), dtype=jnp.float32) * 0.1
    w2 = jax.random.normal(k3, (hidden, output_size), dtype=jnp.float32) * 0.1
    b2 = jax.random.normal(k4, (1, output_size), dtype=jnp.float32) * 0.1

    # Hidden-dim padding done once, outside the forward path.
    w1p, b1p, w2p, b2p = prepare_params(w1, b1, w2, b2)

    def ref_fwd(xv):
        h = xv @ w1 + b1
        h = jnp.where(h >= 0, h, 0.01 * h)
        return h @ w2 + b2

    # 1) toy batch (B=2): grid-less whole-array-VMEM path.
    x_small = jax.random.normal(kx, (2, input_size), dtype=jnp.float32)
    out_small = jax.block_until_ready(cnn_forward(x_small, w1p, b1p, w2p, b2p))
    assert out_small.shape == (2, output_size)
    assert jnp.allclose(out_small, ref_fwd(x_small), atol=1e-5, rtol=1e-5)

    # 2) aligned batch: batch-tiled "parallel" grid (2 steps), weights resident.
    x_big = jax.random.normal(kx2, (2048, input_size), dtype=jnp.float32)
    out_big = jax.block_until_ready(
        cnn_forward(x_big, w1p, b1p, w2p, b2p, block_b=1024))
    assert out_big.shape == (2048, output_size)
    assert jnp.allclose(out_big, ref_fwd(x_big), atol=1e-4, rtol=1e-4)

    # 3) misaligned batch (B % tb != 0): exercises partial-block handling with
    #    no explicit padding pass.
    x_odd = jax.random.normal(kx3, (1900, input_size), dtype=jnp.float32)
    out_odd = jax.block_until_ready(cnn_forward(x_odd, w1p, b1p, w2p, b2p))
    assert out_odd.shape == (1900, output_size)
    assert jnp.allclose(out_odd, ref_fwd(x_odd), atol=1e-4, rtol=1e-4)

    print("KERNEL_OK")
</pallas_src>

<mosaic_0001>
module attributes {stable_mosaic.version = 11 : i64} {
  func.func @_mlp_kernel(%arg0: memref<2x32xf32, #tpu.memory_space<vmem>>, %arg1: memref<32x128xf32, #tpu.memory_space<vmem>>, %arg2: memref<1x128xf32, #tpu.memory_space<vmem>>, %arg3: memref<128x8xf32, #tpu.memory_space<vmem>>, %arg4: memref<1x8xf32, #tpu.memory_space<vmem>>, %arg5: memref<2x8xf32, #tpu.memory_space<vmem>>) attributes {dimension_semantics = [], scalar_prefetch = 0 : i64, scratch_operands = 0 : i64, tpu.core_type = #tpu.core_type<tc>} {
    %c0 = arith.constant 0 : index
    %c0_0 = arith.constant 0 : index
    %0 = vector.load %arg0[%c0, %c0_0] : memref<2x32xf32, #tpu.memory_space<vmem>>, vector<2x32xf32>
    %c0_1 = arith.constant 0 : index
    %c0_2 = arith.constant 0 : index
    %1 = vector.load %arg1[%c0_1, %c0_2] : memref<32x128xf32, #tpu.memory_space<vmem>>, vector<32x128xf32>
    %cst = arith.constant dense<0.000000e+00> : vector<2x128xf32>
    %2 = tpu.matmul %0, %1, %cst {dimension_numbers = #tpu.dot_dimension_numbers<[1], [0], [0], [1], [0, 0, 1, 1], [], []>, precision = #tpu.contract_precision<fp32>} : vector<2x32xf32>, vector<32x128xf32>, vector<2x128xf32> -> vector<2x128xf32>
    %c0_3 = arith.constant 0 : index
    %c0_4 = arith.constant 0 : index
    %3 = vector.load %arg2[%c0_3, %c0_4] : memref<1x128xf32, #tpu.memory_space<vmem>>, vector<1x128xf32>
    %4 = vector.broadcast %3 : vector<1x128xf32> to vector<2x128xf32>
    %5 = arith.addf %2, %4 : vector<2x128xf32>
    %cst_5 = arith.constant 0.00999999977 : f32
    %6 = vector.broadcast %cst_5 : f32 to vector<2x128xf32>
    %7 = arith.mulf %6, %5 : vector<2x128xf32>
    %8 = arith.maximumf %5, %7 : vector<2x128xf32>
    %c0_6 = arith.constant 0 : index
    %c0_7 = arith.constant 0 : index
    %9 = vector.load %arg3[%c0_6, %c0_7] : memref<128x8xf32, #tpu.memory_space<vmem>>, vector<128x8xf32>
    %cst_8 = arith.constant dense<0.000000e+00> : vector<2x8xf32>
    %10 = tpu.matmul %8, %9, %cst_8 {dimension_numbers = #tpu.dot_dimension_numbers<[1], [0], [0], [1], [0, 0, 1, 1], [], []>, precision = #tpu.contract_precision<fp32>} : vector<2x128xf32>, vector<128x8xf32>, vector<2x8xf32> -> vector<2x8xf32>
    %c0_9 = arith.constant 0 : index
    %c0_10 = arith.constant 0 : index
    %11 = vector.load %arg4[%c0_9, %c0_10] : memref<1x8xf32, #tpu.memory_space<vmem>>, vector<1x8xf32>
    %12 = vector.broadcast %11 : vector<1x8xf32> to vector<2x8xf32>
    %13 = arith.addf %10, %12 : vector<2x8xf32>
    %c0_11 = arith.constant 0 : index
    %c0_12 = arith.constant 0 : index
    %14 = vector.load %arg5[%c0_11, %c0_12] : memref<2x8xf32, #tpu.memory_space<vmem>>, vector<2x8xf32>
    tpu.vector_store %arg5[%c0_11, %c0_12], %13 {strides = array<i32>} : memref<2x8xf32, #tpu.memory_space<vmem>>, vector<2x8xf32>,
    return
  }
}

</mosaic_0001>

<bundles_post_ra>
// kernel: tpu_custom_call.1
= control target key start
LH: loop header
LB: loop body
LE: loop exit
PB: predicated region body
PF: predicated region fallthrough
CT: control target
= control target key end

     0   :  { %vm33_vm0 = vcmask 261120   ;;  %v1639_v3 = vmov 0.0   ;;  %vm1640_vm1 = vmmov 0   ;;  %s2179_s0 = inlined_call_operand.vmem [shape: f32[2,32], index: 0, kind: input, shape index: {}]   ;;  %s2180_s1 = inlined_call_operand.vmem [shape: f32[32,128], index: 1, kind: input, shape index: {}]   ;;  %s2181_s2 = inlined_call_operand.vmem [shape: f32[1,128], index: 2, kind: input, shape index: {}]   ;;  %s2182_s3 = inlined_call_operand.vmem [shape: f32[128,8], index: 3, kind: input, shape index: {}]   ;;  %s2183_s4 = inlined_call_operand.vmem [shape: f32[1,8], index: 4, kind: input, shape index: {}]   ;;  %s2184_s5 = inlined_call_operand.hbm [shape: f32[2,8], index: 5, kind: output, shape index: {}]  }
   0x1   :  { %v25_v0 = vld [vmem:[%s2180_s1 + $0x18] sm:$0xff]  ;;  %v24_v1 = vld [vmem:[%s2180_s1 + $0x10] sm:$0xff]  ;;  %v23_v2 = vld [vmem:[%s2180_s1 + $0x8] sm:$0xff]  ;;  %1338 = vmatprep.subr.mxu0 %v1639_v3  ;;  %1349 = vmatprep.subr.mxu1 %v1639_v3 }
   0x2   :  { %v1682_v4 = vand.u32 4294901760, %v25_v0  ;;  %v1684_v5 = vand.u32 4294901760, %v24_v1  ;;  %v1686_v6 = vand.u32 4294901760, %v23_v2  ;;  %v22_v7 = vld [vmem:[%s2180_s1] sm:$0xff]  ;;  %1346 = vmatprep.mubr.msk.f32.mxu0 %vm1640_vm1, %v1639_v3  ;;  %1357 = vmatprep.mubr.msk.f32.mxu1 %vm1640_vm1, %v1639_v3 }
   0x3   :  { %v21_v8 = vld [vmem:[%s2179_s0] sm:$0x3]  ;;  %v1695_v9 = vand.u32 4294901760, %v22_v7 }
   0x4   :  { %v35_v10 = vsel %vm33_vm0, %v21_v8, 0  ;;  %1339 = vmatpush3.msra.mxu0 %v1682_v4  ;;  %v142_v11 = vsub.f32 %v25_v0, %v1682_v4  ;;  %v149_v13 = vsub.f32 %v24_v1, %v1684_v5  ;;  %v1707_v14 = vsub.f32 %v23_v2, %v1686_v6 }
   0x5   :  { %v1703_v12 = vand.u32 4294901760, %v35_v10 }
   0x6   :  { %10 = vsyncpa [#allocation3], 0  ;;  %1340 = vmatprep.subr.mxu0 %v1639_v3  ;;  %v1711_v15 = vsub.f32 %v22_v7, %v1695_v9  ;;  %v143_v16 = vand.u32 4294901760, %v142_v11  ;;  %v150_v18 = vand.u32 4294901760, %v149_v13  ;;  %v157_v19 = vand.u32 4294901760, %v1707_v14  ;;  %v539_v32 = vld [vmem:[%s2182_s3 + $0x78] sm:$0xff] }
   0x7   :  { %1341 = vmatpush3.msra.mxu0 %v1684_v5  ;;  %v107_v17 = vsub.f32 %v35_v10, %v1703_v12  ;;  %v538_v33 = vld [vmem:[%s2182_s3 + $0x70] sm:$0xff]  ;;  %v1739_v34 = vand.u32 4294901760, %v539_v32  ;;  %v537_v44 = vld [vmem:[%s2182_s3 + $0x68] sm:$0xff]  ;;  %v536_v46 = vld [vmem:[%s2182_s3 + $0x60] sm:$0xff]  ;;  %s1641_s8 = smov [#allocation2]   ;;  %vm1188_vm2 = vcmask 58368  }
   0x8   :  { %1342 = vmatprep.subr.mxu0 %v1639_v3  ;;  %v164_v20 = vand.u32 4294901760, %v1711_v15  ;;  %v144_v21 = vsub.f32 %v142_v11, %v143_v16  ;;  %v151_v23 = vsub.f32 %v149_v13, %v150_v18  ;;  %v158_v24 = vsub.f32 %v1707_v14, %v157_v19  ;;  %v535_v49 = vld [vmem:[%s2182_s3 + $0x58] sm:$0xff]  ;;  %v534_v53 = vld [vmem:[%s2182_s3 + $0x50] sm:$0xff]  ;;  %v533_v58 = vld [vmem:[%s2182_s3 + $0x48] sm:$0xff]  ;;  %s1196_s9 = sshll.u32 %s1641_s8, 4  ;;  %s1197_s9 = int_to_ptr.vmem [resolvable:$true] %s1196_s9 }
   0x9   :  { %1343 = vmatpush3.msra.mxu0 %v1686_v6  ;;  %v108_v22 = vand.u32 4294901760, %v107_v17  ;;  %v1746_v35 = vand.u32 4294901760, %v538_v33  ;;  %v1751_v36 = vsub.f32 %v539_v32, %v1739_v34  ;;  %v1802_v45 = vand.u32 4294901760, %v537_v44  ;;  %v532_v0 = vld [vmem:[%s2182_s3 + $0x40] sm:$0xff]  ;;  %v531_v7 = vld [vmem:[%s2182_s3 + $0x38] sm:$0xff]  ;;  %s1617_s10 = scalar_lea.vmem %s1197_s9, 32  ;;  %p1622_p1 = scmp.lt.s32.totalorder %s1197_s9, %s1197_s9 }
   0xa   :  { %1344 = vmatprep.subr.mxu0 %v1639_v3  ;;  %v145_v25 = vand.u32 4294901760, %v144_v21  ;;  %v152_v27 = vand.u32 4294901760, %v151_v23  ;;  %v165_v28 = vsub.f32 %v1711_v15, %v164_v20  ;;  %v159_v30 = vand.u32 4294901760, %v158_v24  ;;  %p1618_p0 = scmp.ne.s32.totalorder %s1197_s9, %s1617_s10  ;;  %p1623_p2 = scmp.lt.s32.totalorder %s1617_s10, %s1617_s10 }
   0xb   :  { %1345 = vmatpush3.msra.mxu0 %v1695_v9  ;;  %v109_v26 = vsub.f32 %v107_v17, %v108_v22  ;;  %v1757_v37 = vsub.f32 %v538_v33, %v1746_v35  ;;  %v641_v38 = vand.u32 4294901760, %v1751_v36  ;;  %v1808_v47 = vsub.f32 %v537_v44, %v1802_v45 }
   0xc   :  { %1360 = vmatprep.subr.mxu0 %v1639_v3  ;;  %1350 = vmatpush3.msra.mxu1 %v145_v25  ;;  %v166_v31 = vand.u32 4294901760, %v165_v28  ;;  %v1810_v48 = vand.u32 4294901760, %v536_v46  ;;  %v1821_v52 = vand.u32 4294901760, %v535_v49  ;;  %v1835_v57 = vand.u32 4294901760, %v534_v53  ;;  %v528_v25 = vld [vmem:[%s2182_s3 + $0x20] sm:$0xff]  ;;  %p1624_p3 = por %p1623_p2, %p1622_p1 }
   0xd   :  { %v110_v29 = vand.u32 4294901760, %v109_v26  ;;  %1351 = vmatprep.subr.mxu1 %v1639_v3  ;;  %v648_v39 = vand.u32 4294901760, %v1757_v37  ;;  %v642_v40 = vsub.f32 %v1751_v36, %v641_v38  ;;  %v655_v50 = vand.u32 4294901760, %v1808_v47 }
   0xe   :  { %1352 = vmatpush3.msra.mxu1 %v152_v27  ;;  %v1819_v51 = vsub.f32 %v536_v46, %v1810_v48  ;;  %v1833_v56 = vsub.f32 %v535_v49, %v1821_v52  ;;  %v1847_v62 = vsub.f32 %v534_v53, %v1835_v57  ;;  %v1850_v63 = vand.u32 4294901760, %v533_v58  ;;  %p1625_p4 = pnand %p1624_p3, %p1618_p0 }
   0xf   :  { %1347 = vmatmul.mubr.f32.vlgmr.msra.gmra.mxu0 %v110_v29  ;;  %1353 = vmatprep.subr.mxu1 %v1639_v3  ;;  %v649_v41 = vsub.f32 %v1757_v37, %v648_v39  ;;  %v643_v42 = vand.u32 4294901760, %v642_v40  ;;  %v656_v54 = vsub.f32 %v1808_v47, %v655_v50 }
  0x10   :  { %1361 = vmatpush3.msra.mxu0 %v142_v11  ;;  %1354 = vmatpush3.msra.mxu1 %v159_v30  ;;  %v662_v55 = vand.u32 4294901760, %v1819_v51  ;;  %v669_v61 = vand.u32 4294901760, %v1833_v56  ;;  %v1876_v11 = vand.u32 4294901760, %v531_v7  ;;  %v1923_v30 = vand.u32 4294901760, %v528_v25 }
  0x11   :  { %1362 = vmatprep.subr.mxu0 %v1639_v3  ;;  %1355 = vmatprep.subr.mxu1 %v1639_v3  ;;  %v650_v43 = vand.u32 4294901760, %v649_v41  ;;  %v657_v59 = vand.u32 4294901760, %v656_v54 }
  0x12   :  { %1363 = vmatpush3.msra.mxu0 %v149_v13  ;;  %1356 = vmatpush3.msra.mxu1 %v166_v31  ;;  %v663_v60 = vsub.f32 %v1819_v51, %v662_v55  ;;  %v670_v2 = vsub.f32 %v1833_v56, %v669_v61  ;;  %v530_v13 = vld [vmem:[%s2182_s3 + $0x30] sm:$0xff]  ;;  %v527_v31 = vld [vmem:[%s2182_s3 + $0x18] sm:$0xff] }
  0x13   :  { %1364 = vmatprep.subr.mxu0 %v1639_v3  ;;  %1358 = vmatmul.mubr.f32.vlgmr.msra.gmra.mxu1 %v1703_v12  ;;  %v1934_v41 = vand.u32 4294901760, %v527_v31 }
  0x14   :  { %1365 = vmatpush3.msra.mxu0 %v1707_v14  ;;  %1371 = vmatprep.subr.mxu1 %v1639_v3  ;;  %v664_v1 = vand.u32 4294901760, %v663_v60  ;;  %v671_v8 = vand.u32 4294901760, %v670_v2 }
  0x15   :  { %1366 = vmatprep.subr.mxu0 %v1639_v3  ;;  %1372 = vmatpush3.msra.mxu1 %v1682_v4  ;;  %v1949_v49 = vsub.f32 %v527_v31, %v1934_v41 }
  0x16   :  { %1367 = vmatpush3.msra.mxu0 %v1711_v15  ;;  %1368 = vmatprep.mubr.msk.f32.mxu0 %vm1640_vm1, %v1639_v3 }
  0x17   :  { %1373 = vmatprep.subr.mxu1 %v1639_v3  ;;  %1382 = vmatprep.subr.mxu0 %v1639_v3  ;;  %v2188_v60 = vand.u32 4294901760, %v1949_v49 }
  0x18   :  { %1369 = vmatmul.mubr.f32.vlgmr.msra.gmra.mxu0 %v107_v17  ;;  %1374 = vmatpush3.msra.mxu1 %v1684_v5  ;;  %v1889_v17 = vand.u32 4294901760, %v530_v13 }
  0x19   :  { %1383 = vmatpush3.msra.mxu0 %v143_v16  ;;  %1375 = vmatprep.subr.mxu1 %v1639_v3  ;;  %v1887_v16 = vsub.f32 %v531_v7, %v1876_v11  ;;  %v524_v7 = vld [vmem:[%s2182_s3] sm:$0xff] }
  0x1a   :  { %1384 = vmatprep.subr.mxu0 %v1639_v3  ;;  %1376 = vmatpush3.msra.mxu1 %v1686_v6 }
  0x1b   :  { %1385 = vmatpush3.msra.mxu0 %v150_v18  ;;  %1377 = vmatprep.subr.mxu1 %v1639_v3  ;;  %v697_v21 = vand.u32 4294901760, %v1887_v16 }
  0x1c   :  { %1386 = vmatprep.subr.mxu0 %v1639_v3  ;;  %1378 = vmatpush3.msra.mxu1 %v1695_v9 }
  0x1d   :  { %1379 = vmatprep.mubr.msk.f32.mxu1 %vm1640_vm1, %v1639_v3  ;;  %1387 = vmatpush3.msra.mxu0 %v157_v19  ;;  %v529_v19 = vld [vmem:[%s2182_s3 + $0x28] sm:$0xff]  ;;  %v698_v27 = vsub.f32 %v1887_v16, %v697_v21 }
  0x1e   :  { %1380 = vmatmul.mubr.f32.vlgmr.msra.gmra.mxu1 %v108_v22  ;;  %1388 = vmatprep.subr.mxu0 %v1639_v3  ;;  %v1905_v22 = vsub.f32 %v530_v13, %v1889_v17  ;;  %v1907_v23 = vand.u32 4294901760, %v529_v19 }
  0x1f   :  { %1393 = vmatprep.subr.mxu1 %v1639_v3  ;;  %1389 = vmatpush3.msra.mxu0 %v164_v20  ;;  %v699_v32 = vand.u32 4294901760, %v698_v27 }
  0x20   :  { %1390 = vmatprep.mubr.msk.f32.mxu0 %vm1640_vm1, %v1639_v3  ;;  %1394 = vmatpush3.msra.mxu1 %v1682_v4  ;;  %v676_v4 = vand.u32 4294901760, %v1847_v62  ;;  %v704_v28 = vand.u32 4294901760, %v1905_v22  ;;  %v1920_v29 = vsub.f32 %v529_v19, %v1907_v23 }
  0x21   :  { %1391 = vmatmul.mubr.f32.vlgmr.msra.gmra.mxu0 %v1703_v12  ;;  %1395 = vmatprep.subr.mxu1 %v1639_v3 }
  0x22   :  { %1401 = vmatprep.mubr.msk.f32.mxu1 %vm1640_vm1, %v1639_v3  ;;  %1396 = vmatpush3.msra.mxu1 %v1684_v5  ;;  %v1860_v5 = vand.u32 4294901760, %v532_v0  ;;  %v705_v33 = vsub.f32 %v1905_v22, %v704_v28  ;;  %v2190_v40 = vand.u32 4294901760, %v1920_v29 }
  0x23   :  { %1404 = vmatprep.subr.mxu0 %v1639_v3  ;;  %1397 = vmatprep.subr.mxu1 %v1639_v3 }
  0x24   :  { %1405 = vmatpush3.msra.mxu0 %v1739_v34  ;;  %1398 = vmatpush3.msra.mxu1 %v1686_v6  ;;  %v1864_v6 = vsub.f32 %v533_v58, %v1850_v63  ;;  %v1874_v10 = vsub.f32 %v532_v0, %v1860_v5  ;;  %v706_v44 = vand.u32 4294901760, %v705_v33  ;;  %v712_v46 = vsub.f32 %v1920_v29, %v2190_v40  ;;  %v525_v58 = vld [vmem:[%s2182_s3 + $0x8] sm:$0xff] }
  0x25   :  { %1406 = vmatprep.subr.mxu0 %v1639_v3  ;;  %1399 = vmatprep.subr.mxu1 %v1639_v3 }
  0x26   :  { %1407 = vmatpush3.msra.mxu0 %v1746_v35  ;;  %1400 = vmatpush3.msra.mxu1 %v1695_v9  ;;  %v677_v9 = vsub.f32 %v1847_v62, %v676_v4  ;;  %v690_v15 = vand.u32 4294901760, %v1874_v10 }
  0x27   :  { %1408 = vmatprep.subr.mxu0 %v1639_v3  ;;  %1402 = vmatmul.mubr.f32.vlgmr.msra.gmra.mxu1 %v1703_v12  ;;  %v683_v12 = vand.u32 4294901760, %v1864_v6 }
  0x28   :  { %1439 = vmatprep.subr.mxu1 %v1639_v3  ;;  %1471 = vmatprep.mubr.msk.f32.mxu1 %vm1640_vm1, %v1639_v3  ;;  %v678_v14 = vand.u32 4294901760, %v677_v9  ;;  %v691_v20 = vsub.f32 %v1874_v10, %v690_v15 }
  0x29   :  { %1440 = vmatpush3.msra.mxu1 %v643_v42  ;;  %1436 = vmatprep.mubr.msk.f32.mxu0 %vm1640_vm1, %v1639_v3  ;;  %v684_v18 = vsub.f32 %v1864_v6, %v683_v12  ;;  %v1938_v42 = vsub.f32 %v528_v25, %v1923_v30 }
  0x2a   :  { %1441 = vmatprep.subr.mxu1 %v1639_v3  ;;  %1409 = vmatpush3.msra.mxu0 %v1802_v45  ;;  %v692_v26 = vand.u32 4294901760, %v691_v20 }
  0x2b   :  { %1442 = vmatpush3.msra.mxu1 %v650_v43  ;;  %1410 = vmatprep.subr.mxu0 %v1639_v3  ;;  %v685_v24 = vand.u32 4294901760, %v684_v18  ;;  %v526_v43 = vld [vmem:[%s2182_s3 + $0x10] sm:$0xff]  ;;  %v2189_v54 = vand.u32 4294901760, %v1938_v42 }
  0x2c   :  { %1443 = vmatprep.subr.mxu1 %v1639_v3  ;;  %1411 = vmatpush3.msra.mxu0 %v1810_v48  ;;  %v1951_v53 = vand.u32 4294901760, %v526_v43 }
  0x2d   :  { %1412 = vmatprep.subr.mxu0 %v1639_v3  ;;  %1444 = vmatpush3.msra.mxu1 %v657_v59  ;;  %v713_v59 = vand.u32 4294901760, %v712_v46  ;;  %v719_v2 = vsub.f32 %v1938_v42, %v2189_v54 }
  0x2e   :  { %1413 = vmatpush3.msra.mxu0 %v1821_v52  ;;  %1445 = vmatprep.subr.mxu1 %v1639_v3  ;;  %v1962_v0 = vsub.f32 %v526_v43, %v1951_v53 }
  0x2f   :  { %1414 = vmatprep.subr.mxu0 %v1639_v3  ;;  %1446 = vmatpush3.msra.mxu1 %v664_v1  ;;  %v1964_v1 = vand.u32 4294901760, %v525_v58  ;;  %v720_v18 = vand.u32 4294901760, %v719_v2 }
  0x30   :  { %1415 = vmatpush3.msra.mxu0 %v1835_v57  ;;  %1447 = vmatprep.subr.mxu1 %v1639_v3  ;;  %v2187_v9 = vand.u32 4294901760, %v1962_v0 }
  0x31   :  { %1416 = vmatprep.subr.mxu0 %v1639_v3  ;;  %1448 = vmatpush3.msra.mxu1 %v671_v8  ;;  %v726_v8 = vsub.f32 %v1949_v49, %v2188_v60  ;;  %v1980_v13 = vsub.f32 %v525_v58, %v1964_v1 }
  0x32   :  { %1417 = vmatpush3.msra.mxu0 %v1850_v63  ;;  %1449 = vmatprep.subr.mxu1 %v1639_v3  ;;  %v733_v20 = vsub.f32 %v1962_v0, %v2187_v9 }
  0x33   :  { %1418 = vmatprep.subr.mxu0 %v1639_v3  ;;  %1450 = vmatpush3.msra.mxu1 %v678_v14  ;;  %v1982_v14 = vand.u32 4294901760, %v524_v7  ;;  %v727_v19 = vand.u32 4294901760, %v726_v8 }
  0x34   :  { %1419 = vmatpush3.msra.mxu0 %v1860_v5  ;;  %1451 = vmatprep.subr.mxu1 %v1639_v3 }
  0x35   :  { %1420 = vmatprep.subr.mxu0 %v1639_v3  ;;  %1452 = vmatpush3.msra.mxu1 %v685_v24  ;;  %v2186_v24 = vand.u32 4294901760, %v1980_v13  ;;  %v1992_v25 = vsub.f32 %v524_v7, %v1982_v14 }
  0x36   :  { %1421 = vmatpush3.msra.mxu0 %v1876_v11  ;;  %1453 = vmatprep.subr.mxu1 %v1639_v3 }
  0x37   :  { %1422 = vmatprep.subr.mxu0 %v1639_v3  ;;  %1454 = vmatpush3.msra.mxu1 %v692_v26  ;;  %v734_v26 = vand.u32 4294901760, %v733_v20  ;;  %v740_v27 = vsub.f32 %v1980_v13, %v2186_v24  ;;  %v2185_v31 = vand.u32 4294901760, %v1992_v25 }
  0x38   :  { %1423 = vmatpush3.msra.mxu0 %v1889_v17  ;;  %1455 = vmatprep.subr.mxu1 %v1639_v3 }
  0x39   :  { %1424 = vmatprep.subr.mxu0 %v1639_v3  ;;  %1456 = vmatpush3.msra.mxu1 %v699_v32  ;;  %v741_v32 = vand.u32 4294901760, %v740_v27  ;;  %v747_v33 = vsub.f32 %v1992_v25, %v2185_v31 }
  0x3a   :  { %1425 = vmatpush3.msra.mxu0 %v1907_v23  ;;  %1457 = vmatprep.subr.mxu1 %v1639_v3 }
  0x3b   :  { %1426 = vmatprep.subr.mxu0 %v1639_v3  ;;  %1458 = vmatpush3.msra.mxu1 %v706_v44  ;;  %v748_v43 = vand.u32 4294901760, %v747_v33 }
  0x3c   :  { %1427 = vmatpush3.msra.mxu0 %v1923_v30  ;;  %1459 = vmatprep.subr.mxu1 %v1639_v3 }
  0x3d   :  { %1428 = vmatprep.subr.mxu0 %v1639_v3  ;;  %1460 = vmatpush3.msra.mxu1 %v713_v59  ;;  %v1204_v59 = vld [vmem:[%s2181_s2] ss:$0 sm:$0xff] }
  0x3e   :  { %1429 = vmatpush3.msra.mxu0 %v1934_v41  ;;  %1461 = vmatprep.subr.mxu1 %v1639_v3 }
  0x3f   :  { %1430 = vmatprep.subr.mxu0 %v1639_v3  ;;  %1462 = vmatpush3.msra.mxu1 %v720_v18 }
  0x40   :  { %1431 = vmatpush3.msra.mxu0 %v1951_v53  ;;  %1463 = vmatprep.subr.mxu1 %v1639_v3 }
  0x41   :  { %1432 = vmatprep.subr.mxu0 %v1639_v3  ;;  %1464 = vmatpush3.msra.mxu1 %v727_v19 }
  0x42   :  { %1433 = vmatpush3.msra.mxu0 %v1964_v1  ;;  %1465 = vmatprep.subr.mxu1 %v1639_v3 }
  0x43   :  { %1434 = vmatprep.subr.mxu0 %v1639_v3  ;;  %1466 = vmatpush3.msra.mxu1 %v734_v26 }
  0x44   :  { %1435 = vmatpush3.msra.mxu0 %v1982_v14  ;;  %1467 = vmatprep.subr.mxu1 %v1639_v3 }
  0x45   :  { %1474 = vmatprep.subr.mxu0 %v1639_v3  ;;  %1468 = vmatpush3.msra.mxu1 %v741_v32 }
  0x46   :  { %1469 = vmatprep.subr.mxu1 %v1639_v3 }
  0x47   :  { %1470 = vmatpush3.msra.mxu1 %v748_v43 }
  0x48   :  { %1509 = vmatprep.subr.mxu1 %v1639_v3 }
  0xcf   :  { %v112_v44 = vpop.f32.mrf.mxu0 }
  0xd0   :  { %v113_v8 = vadd.f32 %v1204_v59, %v112_v44 }
  0xd1   :  { %v1348_v46 = vpop.f32.mrf.mxu0 }
  0xd3   :  { %v203_v58 = vpop.f32.mrf.mxu1 }
  0xd4   :  { %v204_v19 = vadd.f32 %v203_v58, %v113_v8 }
  0xd5   :  { %v1359_v2 = vpop.f32.mrf.mxu1 }
  0xd8   :  { %v283_v7 = vpop.f32.mrf.mxu0 }
  0xd9   :  { %v284_v27 = vadd.f32 %v283_v7, %v204_v19 }
  0xda   :  { %v1370_v18 = vpop.f32.mrf.mxu0 }
  0xde   :  { %v360_v20 = vpop.f32.mrf.mxu1 }
  0xdf   :  { %v361_v33 = vadd.f32 %v360_v20, %v284_v27 }
  0xe0   :  { %v1381_v26 = vpop.f32.mrf.mxu1 }
  0xe1   :  { %v443_v32 = vpop.f32.mrf.mxu0 }
  0xe2   :  { %v444_v31 = vadd.f32 %v443_v32, %v361_v33 }
  0xe3   :  { %v1392_v43 = vpop.f32.mrf.mxu0 }
  0xe7   :  { %v518_v24 = vpop.f32.mrf.mxu1 }
  0xe8   :  { %v519_v9 = vadd.f32 %v518_v24, %v444_v31 }
  0xe9   :  { %v1403_v46 = vpop.f32.mrf.mxu1 }
  0xea   :  { %v522_v60 = vmul.f32 0.01, %v519_v9 }
  0xec   :  { %v523_v54 = vmax.f32 %v519_v9, %v522_v60 }
  0xee   :  { %v2012_v40 = vand.u32 4294901760, %v523_v54 }
  0xf0   :  { %v2015_v2 = vsub.f32 %v523_v54, %v2012_v40  ;;  %1472 = vmatmul.mubr.f32.vlgmr.msra.gmra.mxu1 %v2012_v40 }
  0xf1   :  { %1510 = vmatpush3.msra.mxu1 %v1739_v34  ;;  %1541 = vmatprep.mubr.msk.f32.mxu1 %vm1640_vm1, %v1639_v3 }
  0xf2   :  { %v630_v44 = vand.u32 4294901760, %v2015_v2  ;;  %1511 = vmatprep.subr.mxu1 %v1639_v3 }
  0xf3   :  { %1512 = vmatpush3.msra.mxu1 %v1746_v35 }
  0xf4   :  { %1513 = vmatprep.subr.mxu1 %v1639_v3  ;;  %v631_v60 = vsub.f32 %v2015_v2, %v630_v44 }
  0xf5   :  { %1514 = vmatpush3.msra.mxu1 %v1802_v45 }
  0xf6   :  { %1515 = vmatprep.subr.mxu1 %v1639_v3  ;;  %v632_v54 = vand.u32 4294901760, %v631_v60 }
  0xf7   :  { %1516 = vmatpush3.msra.mxu1 %v1810_v48 }
  0xf8   :  { %1517 = vmatprep.subr.mxu1 %v1639_v3  ;;  %1437 = vmatmul.mubr.f32.vlgmr.msra.gmra.mxu0 %v632_v54 }
  0xf9   :  { %1475 = vmatpush3.msra.mxu0 %v1751_v36  ;;  %1518 = vmatpush3.msra.mxu1 %v1821_v52  ;;  %v2193_v36 = vand.u32 4294901760, %v1949_v49 }
  0xfa   :  { %1476 = vmatprep.subr.mxu0 %v1639_v3  ;;  %1519 = vmatprep.subr.mxu1 %v1639_v3 }
  0xfb   :  { %1477 = vmatpush3.msra.mxu0 %v1757_v37  ;;  %1520 = vmatpush3.msra.mxu1 %v1835_v57  ;;  %v2194_v37 = vand.u32 4294901760, %v1962_v0 }
  0xfc   :  { %1478 = vmatprep.subr.mxu0 %v1639_v3  ;;  %1521 = vmatprep.subr.mxu1 %v1639_v3 }
  0xfd   :  { %1479 = vmatpush3.msra.mxu0 %v1808_v47  ;;  %1522 = vmatpush3.msra.mxu1 %v1850_v63 }
  0xfe   :  { %1480 = vmatprep.subr.mxu0 %v1639_v3  ;;  %1523 = vmatprep.subr.mxu1 %v1639_v3 }
  0xff   :  { %1481 = vmatpush3.msra.mxu0 %v1819_v51  ;;  %1524 = vmatpush3.msra.mxu1 %v1860_v5 }
 0x100   :  { %1482 = vmatprep.subr.mxu0 %v1639_v3  ;;  %1525 = vmatprep.subr.mxu1 %v1639_v3 }
 0x101   :  { %1483 = vmatpush3.msra.mxu0 %v1833_v56  ;;  %1526 = vmatpush3.msra.mxu1 %v1876_v11 }
 0x102   :  { %1484 = vmatprep.subr.mxu0 %v1639_v3  ;;  %1527 = vmatprep.subr.mxu1 %v1639_v3 }
 0x103   :  { %1485 = vmatpush3.msra.mxu0 %v1847_v62  ;;  %1528 = vmatpush3.msra.mxu1 %v1889_v17 }
 0x104   :  { %1486 = vmatprep.subr.mxu0 %v1639_v3  ;;  %1529 = vmatprep.subr.mxu1 %v1639_v3 }
 0x105   :  { %1487 = vmatpush3.msra.mxu0 %v1864_v6  ;;  %1530 = vmatpush3.msra.mxu1 %v1907_v23 }
 0x106   :  { %1488 = vmatprep.subr.mxu0 %v1639_v3  ;;  %1531 = vmatprep.subr.mxu1 %v1639_v3 }
 0x107   :  { %1489 = vmatpush3.msra.mxu0 %v1874_v10  ;;  %1532 = vmatpush3.msra.mxu1 %v1923_v30 }
 0x108   :  { %1490 = vmatprep.subr.mxu0 %v1639_v3  ;;  %1533 = vmatprep.subr.mxu1 %v1639_v3 }
 0x109   :  { %1491 = vmatpush3.msra.mxu0 %v1887_v16  ;;  %1534 = vmatpush3.msra.mxu1 %v1934_v41 }
 0x10a   :  { %1492 = vmatprep.subr.mxu0 %v1639_v3  ;;  %1535 = vmatprep.subr.mxu1 %v1639_v3 }
 0x10b   :  { %1493 = vmatpush3.msra.mxu0 %v1905_v22  ;;  %1536 = vmatpush3.msra.mxu1 %v1951_v53 }
 0x10c   :  { %1494 = vmatprep.subr.mxu0 %v1639_v3  ;;  %1537 = vmatprep.subr.mxu1 %v1639_v3 }
 0x10d   :  { %1495 = vmatpush3.msra.mxu0 %v1920_v29  ;;  %1538 = vmatpush3.msra.mxu1 %v1964_v1 }
 0x10e   :  { %1496 = vmatprep.subr.mxu0 %v1639_v3  ;;  %1539 = vmatprep.subr.mxu1 %v1639_v3 }
 0x10f   :  { %1497 = vmatpush3.msra.mxu0 %v1938_v42  ;;  %1540 = vmatpush3.msra.mxu1 %v1982_v14 }
 0x110   :  { %1498 = vmatprep.subr.mxu0 %v1639_v3  ;;  %1542 = vmatmul.mubr.f32.vlgmr.msra.gmra.mxu1 %v630_v44 }
 0x111   :  { %1579 = vmatprep.subr.mxu1 %v1639_v3  ;;  %1499 = vmatpush3.msra.mxu0 %v1949_v49 }
 0x112   :  { %1580 = vmatpush3.msra.mxu1 %v1739_v34  ;;  %1500 = vmatprep.subr.mxu0 %v1639_v3  ;;  %v2191_v34 = vand.u32 4294901760, %v1920_v29 }
 0x113   :  { %1581 = vmatprep.subr.mxu1 %v1639_v3  ;;  %1501 = vmatpush3.msra.mxu0 %v1962_v0 }
 0x114   :  { %1582 = vmatpush3.msra.mxu1 %v1746_v35  ;;  %1502 = vmatprep.subr.mxu0 %v1639_v3  ;;  %v2192_v35 = vand.u32 4294901760, %v1938_v42 }
 0x115   :  { %1583 = vmatprep.subr.mxu1 %v1639_v3  ;;  %1503 = vmatpush3.msra.mxu0 %v1980_v13 }
 0x116   :  { %1584 = vmatpush3.msra.mxu1 %v1802_v45  ;;  %1504 = vmatprep.subr.mxu0 %v1639_v3 }
 0x117   :  { %1585 = vmatprep.subr.mxu1 %v1639_v3  ;;  %1505 = vmatpush3.msra.mxu0 %v1992_v25 }
 0x118   :  { %1506 = vmatprep.mubr.msk.f32.mxu0 %vm1640_vm1, %v1639_v3  ;;  %1586 = vmatpush3.msra.mxu1 %v1810_v48 }
 0x119   :  { %1507 = vmatmul.mubr.f32.vlgmr.msra.gmra.mxu0 %v2015_v2  ;;  %1544 = vmatprep.subr.mxu0 %v1639_v3 }
 0x11a   :  { %1587 = vmatprep.subr.mxu1 %v1639_v3  ;;  %1545 = vmatpush3.msra.mxu0 %v641_v38  ;;  %v2195_v38 = vand.u32 4294901760, %v1980_v13 }
 0x11b   :  { %1588 = vmatpush3.msra.mxu1 %v1821_v52  ;;  %1546 = vmatprep.subr.mxu0 %v1639_v3 }
 0x11c   :  { %1589 = vmatprep.subr.mxu1 %v1639_v3  ;;  %1547 = vmatpush3.msra.mxu0 %v648_v39  ;;  %v2196_v39 = vand.u32 4294901760, %v1992_v25 }
 0x11d   :  { %1590 = vmatpush3.msra.mxu1 %v1835_v57  ;;  %1548 = vmatprep.subr.mxu0 %v1639_v3  ;;  %v1205_v57 = vld [vmem:[%s2183_s4] ss:$0 sm:$0xff] }
 0x11e   :  { %1591 = vmatprep.subr.mxu1 %v1639_v3  ;;  %1549 = vmatpush3.msra.mxu0 %v655_v50 }
 0x11f   :  { %1592 = vmatpush3.msra.mxu1 %v1850_v63  ;;  %1550 = vmatprep.subr.mxu0 %v1639_v3 }
 0x120   :  { %1593 = vmatprep.subr.mxu1 %v1639_v3  ;;  %1551 = vmatpush3.msra.mxu0 %v662_v55 }
 0x121   :  { %1594 = vmatpush3.msra.mxu1 %v1860_v5  ;;  %1552 = vmatprep.subr.mxu0 %v1639_v3 }
 0x122   :  { %1595 = vmatprep.subr.mxu1 %v1639_v3  ;;  %1553 = vmatpush3.msra.mxu0 %v669_v61 }
 0x123   :  { %1596 = vmatpush3.msra.mxu1 %v1876_v11  ;;  %1554 = vmatprep.subr.mxu0 %v1639_v3 }
 0x124   :  { %1597 = vmatprep.subr.mxu1 %v1639_v3  ;;  %1555 = vmatpush3.msra.mxu0 %v676_v4 }
 0x125   :  { %1598 = vmatpush3.msra.mxu1 %v1889_v17  ;;  %1556 = vmatprep.subr.mxu0 %v1639_v3 }
 0x126   :  { %1599 = vmatprep.subr.mxu1 %v1639_v3  ;;  %1557 = vmatpush3.msra.mxu0 %v683_v12 }
 0x127   :  { %1600 = vmatpush3.msra.mxu1 %v1907_v23  ;;  %1558 = vmatprep.subr.mxu0 %v1639_v3 }
 0x128   :  { %1601 = vmatprep.subr.mxu1 %v1639_v3  ;;  %1559 = vmatpush3.msra.mxu0 %v690_v15 }
 0x129   :  { %1602 = vmatpush3.msra.mxu1 %v1923_v30  ;;  %1560 = vmatprep.subr.mxu0 %v1639_v3 }
 0x12a   :  { %1603 = vmatprep.subr.mxu1 %v1639_v3  ;;  %1561 = vmatpush3.msra.mxu0 %v697_v21 }
 0x12b   :  { %1604 = vmatpush3.msra.mxu1 %v1934_v41  ;;  %1562 = vmatprep.subr.mxu0 %v1639_v3 }
 0x12c   :  { %1605 = vmatprep.subr.mxu1 %v1639_v3  ;;  %1563 = vmatpush3.msra.mxu0 %v704_v28 }
 0x12d   :  { %1606 = vmatpush3.msra.mxu1 %v1951_v53  ;;  %1564 = vmatprep.subr.mxu0 %v1639_v3 }
 0x12e   :  { %1607 = vmatprep.subr.mxu1 %v1639_v3  ;;  %1565 = vmatpush3.msra.mxu0 %v2191_v34 }
 0x12f   :  { %1608 = vmatpush3.msra.mxu1 %v1964_v1  ;;  %1566 = vmatprep.subr.mxu0 %v1639_v3 }
 0x130   :  { %1609 = vmatprep.subr.mxu1 %v1639_v3  ;;  %1567 = vmatpush3.msra.mxu0 %v2192_v35 }
 0x131   :  { %1610 = vmatpush3.msra.mxu1 %v1982_v14  ;;  %1611 = vmatprep.mubr.msk.f32.mxu1 %vm1640_vm1, %v1639_v3 }
 0x132   :  { %1568 = vmatprep.subr.mxu0 %v1639_v3  ;;  %1612 = vmatmul.mubr.f32.vlgmr.msra.gmra.mxu1 %v2012_v40 }
 0x133   :  { %1569 = vmatpush3.msra.mxu0 %v2193_v36  ;;  %1576 = vmatprep.mubr.msk.f32.mxu0 %vm1640_vm1, %v1639_v3 }
 0x134   :  { %1570 = vmatprep.subr.mxu0 %v1639_v3 }
 0x135   :  { %1571 = vmatpush3.msra.mxu0 %v2194_v37 }
 0x136   :  { %1572 = vmatprep.subr.mxu0 %v1639_v3 }
 0x137   :  { %1573 = vmatpush3.msra.mxu0 %v2195_v38 }
 0x138   :  { %1574 = vmatprep.subr.mxu0 %v1639_v3 }
 0x139   :  { %1575 = vmatpush3.msra.mxu0 %v2196_v39 }
 0x13a   :  { %1577 = vmatmul.mubr.f32.vlgmr.msra.gmra.mxu0 %v2012_v40 }
 0x1b0   :  { %v785_v45 = vpop.f32.mrf.mxu1 }
 0x1b2   :  { %v1473_v47 = vpop.f32.mrf.mxu1 }
 0x1b8   :  { %v634_v48 = vpop.f32.mrf.mxu0 }
 0x1b9   :  { %v635_v61 = vadd.f32 %v1205_v57, %v634_v48 }
 0x1ba   :  { %v1438_v50 = vpop.f32.mrf.mxu0 }
 0x1bb   :  { %v786_v3 = vadd.f32 %v785_v45, %v635_v61 }
 0x1d0   :  { %v978_v51 = vpop.f32.mrf.mxu1 }
 0x1d2   :  { %v1543_v52 = vpop.f32.mrf.mxu1 }
 0x1d9   :  { %v889_v55 = vpop.f32.mrf.mxu0 }
 0x1da   :  { %v890_v4 = vadd.f32 %v889_v55, %v786_v3 }
 0x1db   :  { %v1508_v56 = vpop.f32.mrf.mxu0 }
 0x1dc   :  { %v979_v5 = vadd.f32 %v978_v51, %v890_v4 }
 0x1f2   :  { %v1184_v62 = vpop.f32.mrf.mxu1 }
 0x1f4   :  { %v1613_v63 = vpop.f32.mrf.mxu1 }
 0x1fa   :  { %v1097_v6 = vpop.f32.mrf.mxu0 }
 0x1fb   :  { %v1098_v10 = vadd.f32 %v1097_v6, %v979_v5 }
 0x1fc   :  { %v1578_v11 = vpop.f32.mrf.mxu0 }
 0x1fd   :  { %v1185_v12 = vadd.f32 %v1184_v62, %v1098_v10 }
 0x1ff   :  { %1189 = vst.msk [vmem:[#allocation2] sm:$0x3] %vm1188_vm2, %v1185_v12 }
 0x200   :  { %1628 = shalt.err (!%p1625_p4)
}
 0x201   :  { %1199 = dma.vmem_to_hbm [thread:$0]  %s1197_s9, 32, %s2184_s5, [#allocation3]  }
 0x202   :  { %1637 = dma.done.wait [#allocation3], 32  }
 0x203   :  { %1638 = vsyncadd [#allocation3], 4294967264 }
 0x204   :  { %1203 = vsyncpa [#allocation3], 1 }

</bundles_post_ra>
